<compile_context>
chip_gen: v7x
topology: tpu7x:2x2x1
jax: 0.10.0
libtpu: 0.0.40
codegen_flags: <defaults>
</compile_context>

<pallas_src>
import functools
import math

import jax
import jax.numpy as jnp
from jax import lax
from jax.experimental import pallas as pl
from jax.experimental.pallas import tpu as pltpu


def _permuter_kernel(bias_ref, x_ref, noise_ref, w_ref,
                     eye_ref, blk_ref, lt_ref, qrk_ref,
                     out_ref, *, n, g, tau):
    """One lane-packed group of g batch elements (gn = g * n).

    Packing (q-major): matrix row r = p*g + j  <-> node p of batch j,
                       matrix col c = q*g + j  <-> sorted-rank q of batch j.
    Output: out_ref[p, q*g + j] = perm_transposed[batch j, p, q].
    """
    gn = n * g
    bias = bias_ref[0]                                     # scalar from SMEM

    noisy = x_ref[...] + 0.05 * noise_ref[...]             # (gn, D)
    # scoring_fc: single exact f32 evaluation per element (VPU + lane reduce).
    s_col = jnp.sum(noisy * w_ref[...], axis=1, keepdims=True) + bias   # (gn, 1)

    blk = blk_ref[...]                                     # (gn, gn) same-batch 1/0
    # Exact lane-layout copy of the same score values (diag select + reduce).
    s_lane = jnp.sum(eye_ref[...] * s_col, axis=0, keepdims=True)       # (1, gn)

    # Descending within-batch rank, stable tie-break on packed element index.
    gt = s_lane > s_col                                    # (gn, gn)
    eq = s_lane == s_col
    beats = jnp.where(gt, blk, 0.0) + jnp.where(eq, lt_ref[...], 0.0)
    rank = jnp.sum(beats, axis=1, keepdims=True)           # (gn, 1), exact ints

    # sorted[c] = score of the element of batch(c) whose rank equals q(c).
    sorted_lane = jnp.sum(jnp.where(rank == qrk_ref[...], s_col * blk, 0.0),
                          axis=0, keepdims=True)           # (1, gn)

    # perm^T, block-structured over the packed batch.  a <= 0 with an exact 0
    # in every column (the sorted value is one of the scores) -> exp is safe
    # without max-subtraction.
    a = jnp.abs(s_col - sorted_lane) * (-1.0 / tau)        # (gn, gn)
    e = jnp.exp(a) * blk
    z = jnp.sum(e, axis=0, keepdims=True)                  # (1, gn), >= 1
    # q-major packing: sublane band [p*g, (p+1)*g) holds exactly one non-zero
    # per column -> block-diagonal compression is a plain segment sum.
    num = jnp.sum(e.reshape(n, g, gn), axis=1)             # (n, gn)
    out_ref[...] = num * pl.reciprocal(z, approx=False)

    # TODO(synk): hard=True straight-through path (topk + scatter_) and the
    # mask_perm branch (mask != None) are not implemented; the forward
    # defaults (hard=False, mask=None) are reproduced exactly.


def _choose_group(batch, n):
    """Batches packed per grid step: g is a multiple of 8 (sublane-aligned
    segment sum) and g*n a multiple of 128 (lane-dense output block);
    g*n capped at 512 (safe across v5e/v6e/v7x VMEM budgets)."""
    g_unit = max(8, 128 // math.gcd(n, 128))
    cap = 512
    if g_unit * n > cap:
        g = g_unit                               # large-n fallback, still aligned
    else:
        g_cap = max(g_unit, (cap // n) // g_unit * g_unit)
        g_need = -(-batch // g_unit) * g_unit
        g = max(g_unit, min(g_cap, g_need))
    num_groups = -(-batch // g)
    return g, num_groups


def permuter_forward(x, noise, w, b, *, tau=1.0):
    """x, noise: (B, N, D); w: scoring_fc weight (1, D); b: scoring_fc bias (1,)."""
    B, N, D = x.shape
    g, num_groups = _choose_group(B, N)
    gn = g * N
    B_pad = g * num_groups
    if B_pad != B:                                # zero-pad batch to group size
        pad = ((0, B_pad - B), (0, 0), (0, 0))
        x = jnp.pad(x, pad)
        noise = jnp.pad(noise, pad)

    # q-major packing inside each group: kernel row p*g + j <-> node p, batch j.
    def pack(a):
        a = a.reshape(num_groups, g, N, D).transpose(0, 2, 1, 3)
        return a.reshape(num_groups * N * g, D).astype(jnp.float32)

    xg, ng = pack(x), pack(noise)
    w_row = jnp.asarray(w, jnp.float32).reshape(1, D)
    bias = jnp.asarray(b, jnp.float32).reshape(1)

    # Grid-invariant constants (hoisted out of the kernel body; constant
    # index_map => fetched once per core and kept VMEM-resident).
    r = jnp.arange(gn, dtype=jnp.int32)
    same = (r[:, None] % g) == (r[None, :] % g)
    eye_f = jnp.eye(gn, dtype=jnp.float32)
    blk_f = same.astype(jnp.float32)
    lt_f = (same & (r[None, :] < r[:, None])).astype(jnp.float32)
    qrk_f = (r // g).astype(jnp.float32).reshape(1, gn)

    kernel = functools.partial(_permuter_kernel, n=N, g=g, tau=float(tau))
    const = lambda grp, bias: (0, 0)
    out_flat = pl.pallas_call(
        kernel,
        out_shape=jax.ShapeDtypeStruct((N, num_groups * gn), jnp.float32),
        grid_spec=pltpu.PrefetchScalarGridSpec(
            num_scalar_prefetch=1,                          # bias -> SMEM scalar
            grid=(num_groups,),
            in_specs=[
                pl.BlockSpec((gn, D), lambda grp, bias: (grp, 0)),   # node feats
                pl.BlockSpec((gn, D), lambda grp, bias: (grp, 0)),   # noise
                pl.BlockSpec((1, D), const),                         # weight
                pl.BlockSpec((gn, gn), const),                       # eye selector
                pl.BlockSpec((gn, gn), const),                       # same-batch
                pl.BlockSpec((gn, gn), const),                       # tie-break
                pl.BlockSpec((1, gn), const),                        # target ranks
            ],
            out_specs=pl.BlockSpec((N, gn), lambda grp, bias: (0, grp)),
        ),
        compiler_params=pltpu.CompilerParams(
            dimension_semantics=("parallel",)),   # group axis shards across v7x TCs
    )(bias, xg, ng, w_row, eye_f, blk_f, lt_f, qrk_f)

    # out_flat[p, grp*gn + q*g + j] == perm_transposed[batch grp*g + j, p, q].
    # NOTE: consumers that can take the lane-packed (N, B*N) slab should skip
    # this transpose (it is an extra HBM pass done by XLA, not the kernel).
    out = (out_flat.reshape(N, num_groups, N, g)
           .transpose(1, 3, 0, 2)
           .reshape(B_pad, N, N))
    return out[:B]


def _reference_forward(x, noise, w, b, tau=1.0):
    """Pure-JAX transcription of the PyTorch forward (hard=False, mask=None)."""
    noisy = x + 0.05 * noise
    scores = jnp.einsum("bnd,d->bn", noisy, w.reshape(-1),
                        precision=lax.Precision.HIGHEST) + b.reshape(())
    scores_sorted = -jnp.sort(-scores, axis=1)              # descending
    pd = -jnp.abs(scores[:, None, :] - scores_sorted[:, :, None]) / tau
    perm = jax.nn.softmax(pd, axis=-1)
    return jnp.transpose(perm, (0, 2, 1))


if __name__ == "__main__":
    # config: max_sequence_len=8, encoder_msa_dim=4 -> D=32; batch=2; num_nodes=16
    B, N = 2, 16
    MAX_SEQ_LEN, MSA_DIM = 8, 4
    D = MAX_SEQ_LEN * MSA_DIM

    key = jax.random.PRNGKey(0)
    kx, kn, kw, kb = jax.random.split(key, 4)

    x = jax.random.normal(kx, (B, N, D), dtype=jnp.float32)
    # torch.randn_like noise, generated deterministically host-side.
    noise = jax.random.normal(kn, (B, N, D), dtype=jnp.float32)

    # nn.Linear(D, 1) parameters, deterministic init (uniform +-1/sqrt(D)).
    bound = 1.0 / (D ** 0.5)
    w = jax.random.uniform(kw, (1, D), jnp.float32, -bound, bound)   # weight (1, D)
    b = jax.random.uniform(kb, (1,), jnp.float32, -bound, bound)     # bias (1,)

    perm = permuter_forward(x, noise, w, b, tau=1.0)
    jax.block_until_ready(perm)

    assert perm.shape == (B, N, N)
    # perm is the transposed soft permutation: summing over axis 1 must give 1.
    assert jnp.allclose(jnp.sum(perm, axis=1), 1.0, atol=1e-5)

    ref = _reference_forward(x, noise, w, b, tau=1.0)
    assert jnp.allclose(perm, ref, atol=1e-4, rtol=1e-3), \
        float(jnp.max(jnp.abs(perm - ref)))

    print("KERNEL_OK")
</pallas_src>

<mosaic_0001>
module attributes {stable_mosaic.version = 11 : i64} {
  func.func @_permuter_kernel(%arg0: i32, %arg1: memref<1xf32, #tpu.memory_space<smem>>, %arg2: memref<128x32xf32, #tpu.memory_space<vmem>>, %arg3: memref<128x32xf32, #tpu.memory_space<vmem>>, %arg4: memref<1x32xf32, #tpu.memory_space<vmem>>, %arg5: memref<128x128xf32, #tpu.memory_space<vmem>>, %arg6: memref<128x128xf32, #tpu.memory_space<vmem>>, %arg7: memref<128x128xf32, #tpu.memory_space<vmem>>, %arg8: memref<1x128xf32, #tpu.memory_space<vmem>>, %arg9: memref<16x128xf32, #tpu.memory_space<vmem>>) attributes {dimension_semantics = [#tpu.dimension_semantics<parallel>], iteration_bounds = array<i64: 1>, scalar_prefetch = 1 : i64, scratch_operands = 0 : i64, tpu.core_type = #tpu.core_type<tc>, window_params = [{transform_indices = @transform_0, window_bounds = array<i64: 128, 32>}, {transform_indices = @transform_1, window_bounds = array<i64: 128, 32>}, {pipeline_mode = #tpu.pipeline_mode<synchronous>, transform_indices = @transform_2, window_bounds = array<i64: 1, 32>}, {pipeline_mode = #tpu.pipeline_mode<synchronous>, transform_indices = @transform_3, window_bounds = array<i64: 128, 128>}, {pipeline_mode = #tpu.pipeline_mode<synchronous>, transform_indices = @transform_4, window_bounds = array<i64: 128, 128>}, {pipeline_mode = #tpu.pipeline_mode<synchronous>, transform_indices = @transform_5, window_bounds = array<i64: 128, 128>}, {pipeline_mode = #tpu.pipeline_mode<synchronous>, transform_indices = @transform_6, window_bounds = array<i64: 1, 128>}, {transform_indices = @transform_7, window_bounds = array<i64: 16, 128>}]} {
    %c0 = arith.constant 0 : index
    %0 = memref.load %arg1[%c0] : memref<1xf32, #tpu.memory_space<smem>>
    %c0_0 = arith.constant 0 : index
    %c0_1 = arith.constant 0 : index
    %1 = vector.load %arg2[%c0_0, %c0_1] : memref<128x32xf32, #tpu.memory_space<vmem>>, vector<128x32xf32>
    %c0_2 = arith.constant 0 : index
    %c0_3 = arith.constant 0 : index
    %2 = vector.load %arg3[%c0_2, %c0_3] : memref<128x32xf32, #tpu.memory_space<vmem>>, vector<128x32xf32>
    %cst = arith.constant 5.000000e-02 : f32
    %3 = vector.broadcast %cst : f32 to vector<128x32xf32>
    %4 = arith.mulf %3, %2 : vector<128x32xf32>
    %5 = arith.addf %1, %4 : vector<128x32xf32>
    %c0_4 = arith.constant 0 : index
    %c0_5 = arith.constant 0 : index
    %6 = vector.load %arg4[%c0_4, %c0_5] : memref<1x32xf32, #tpu.memory_space<vmem>>, vector<1x32xf32>
    %7 = vector.broadcast %6 : vector<1x32xf32> to vector<128x32xf32>
    %8 = arith.mulf %5, %7 : vector<128x32xf32>
    %cst_6 = arith.constant dense<0.000000e+00> : vector<128xf32>
    %9 = vector.multi_reduction <add>, %8, %cst_6 [1] : vector<128x32xf32> to vector<128xf32>
    %10 = vector.shape_cast %9 : vector<128xf32> to vector<128x1xf32>
    %11 = vector.broadcast %0 : f32 to vector<128x1xf32>
    %12 = arith.addf %10, %11 : vector<128x1xf32>
    %c0_7 = arith.constant 0 : index
    %c0_8 = arith.constant 0 : index
    %13 = vector.load %arg6[%c0_7, %c0_8] : memref<128x128xf32, #tpu.memory_space<vmem>>, vector<128x128xf32>
    %c0_9 = arith.constant 0 : index
    %c0_10 = arith.constant 0 : index
    %14 = vector.load %arg5[%c0_9, %c0_10] : memref<128x128xf32, #tpu.memory_space<vmem>>, vector<128x128xf32>
    %15 = vector.broadcast %12 : vector<128x1xf32> to vector<128x128xf32>
    %16 = arith.mulf %14, %15 : vector<128x128xf32>
    %cst_11 = arith.constant dense<0.000000e+00> : vector<128xf32>
    %17 = vector.multi_reduction <add>, %16, %cst_11 [0] : vector<128x128xf32> to vector<128xf32>
    %18 = vector.shape_cast %17 : vector<128xf32> to vector<1x128xf32>
    %19 = vector.broadcast %18 : vector<1x128xf32> to vector<128x128xf32>
    %20 = vector.broadcast %12 : vector<128x1xf32> to vector<128x128xf32>
    %21 = arith.cmpf ogt, %19, %20 : vector<128x128xf32>
    %22 = vector.broadcast %18 : vector<1x128xf32> to vector<128x128xf32>
    %23 = vector.broadcast %12 : vector<128x1xf32> to vector<128x128xf32>
    %24 = arith.cmpf oeq, %22, %23 : vector<128x128xf32>
    %cst_12 = arith.constant 0.000000e+00 : f32
    %25 = vector.broadcast %cst_12 : f32 to vector<128x128xf32>
    %26 = arith.select %21, %13, %25 : vector<128x128xi1>, vector<128x128xf32>
    %c0_13 = arith.constant 0 : index
    %c0_14 = arith.constant 0 : index
    %27 = vector.load %arg7[%c0_13, %c0_14] : memref<128x128xf32, #tpu.memory_space<vmem>>, vector<128x128xf32>
    %cst_15 = arith.constant 0.000000e+00 : f32
    %28 = vector.broadcast %cst_15 : f32 to vector<128x128xf32>
    %29 = arith.select %24, %27, %28 : vector<128x128xi1>, vector<128x128xf32>
    %30 = arith.addf %26, %29 : vector<128x128xf32>
    %cst_16 = arith.constant dense<0.000000e+00> : vector<128xf32>
    %31 = vector.multi_reduction <add>, %30, %cst_16 [1] : vector<128x128xf32> to vector<128xf32>
    %32 = vector.shape_cast %31 : vector<128xf32> to vector<128x1xf32>
    %c0_17 = arith.constant 0 : index
    %c0_18 = arith.constant 0 : index
    %33 = vector.load %arg8[%c0_17, %c0_18] : memref<1x128xf32, #tpu.memory_space<vmem>>, vector<1x128xf32>
    %34 = vector.broadcast %32 : vector<128x1xf32> to vector<128x128xf32>
    %35 = vector.broadcast %33 : vector<1x128xf32> to vector<128x128xf32>
    %36 = arith.cmpf oeq, %34, %35 : vector<128x128xf32>
    %37 = vector.broadcast %12 : vector<128x1xf32> to vector<128x128xf32>
    %38 = arith.mulf %37, %13 : vector<128x128xf32>
    %cst_19 = arith.constant 0.000000e+00 : f32
    %39 = vector.broadcast %cst_19 : f32 to vector<128x128xf32>
    %40 = arith.select %36, %38, %39 : vector<128x128xi1>, vector<128x128xf32>
    %cst_20 = arith.constant dense<0.000000e+00> : vector<128xf32>
    %41 = vector.multi_reduction <add>, %40, %cst_20 [0] : vector<128x128xf32> to vector<128xf32>
    %42 = vector.shape_cast %41 : vector<128xf32> to vector<1x128xf32>
    %43 = vector.broadcast %12 : vector<128x1xf32> to vector<128x128xf32>
    %44 = vector.broadcast %42 : vector<1x128xf32> to vector<128x128xf32>
    %45 = arith.subf %43, %44 : vector<128x128xf32>
    %46 = math.absf %45 : vector<128x128xf32>
    %cst_21 = arith.constant -1.000000e+00 : f32
    %47 = vector.broadcast %cst_21 : f32 to vector<128x128xf32>
    %48 = arith.mulf %46, %47 : vector<128x128xf32>
    %49 = math.exp %48 : vector<128x128xf32>
    %50 = arith.mulf %49, %13 : vector<128x128xf32>
    %cst_22 = arith.constant dense<0.000000e+00> : vector<128xf32>
    %51 = vector.multi_reduction <add>, %50, %cst_22 [0] : vector<128x128xf32> to vector<128xf32>
    %52 = vector.shape_cast %51 : vector<128xf32> to vector<1x128xf32>
    %53 = vector.shape_cast %50 : vector<128x128xf32> to vector<16x8x128xf32>
    %cst_23 = arith.constant dense<0.000000e+00> : vector<16x128xf32>
    %54 = vector.multi_reduction <add>, %53, %cst_23 [1] : vector<16x8x128xf32> to vector<16x128xf32>
    %55 = tpu.reciprocal %52 : vector<1x128xf32> -> vector<1x128xf32>
    %56 = vector.broadcast %55 : vector<1x128xf32> to vector<16x128xf32>
    %57 = arith.mulf %54, %56 : vector<16x128xf32>
    %c0_24 = arith.constant 0 : index
    %c0_25 = arith.constant 0 : index
    %58 = vector.load %arg9[%c0_24, %c0_25] : memref<16x128xf32, #tpu.memory_space<vmem>>, vector<16x128xf32>
    tpu.vector_store %arg9[%c0_24, %c0_25], %57 {strides = array<i32>} : memref<16x128xf32, #tpu.memory_space<vmem>>, vector<16x128xf32>,
    return
  }
  func.func @transform_0(%arg0: i32, %arg1: memref<1xf32, #tpu.memory_space<smem>>) -> (i32, i32) {
    %c0_i32 = arith.constant 0 : i32
    %c0_i32_0 = arith.constant 0 : i32
    return %arg0, %c0_i32 : i32, i32
  }
  func.func @transform_1(%arg0: i32, %arg1: memref<1xf32, #tpu.memory_space<smem>>) -> (i32, i32) {
    %c0_i32 = arith.constant 0 : i32
    %c0_i32_0 = arith.constant 0 : i32
    return %arg0, %c0_i32 : i32, i32
  }
  func.func @transform_2(%arg0: i32, %arg1: memref<1xf32, #tpu.memory_space<smem>>) -> (i32, i32) {
    %c0_i32 = arith.constant 0 : i32
    %c0_i32_0 = arith.constant 0 : i32
    %c0_i32_1 = arith.constant 0 : i32
    return %c0_i32, %c0_i32_0 : i32, i32
  }
  func.func @transform_3(%arg0: i32, %arg1: memref<1xf32, #tpu.memory_space<smem>>) -> (i32, i32) {
    %c0_i32 = arith.constant 0 : i32
    %c0_i32_0 = arith.constant 0 : i32
    %c0_i32_1 = arith.constant 0 : i32
    return %c0_i32, %c0_i32_0 : i32, i32
  }
  func.func @transform_4(%arg0: i32, %arg1: memref<1xf32, #tpu.memory_space<smem>>) -> (i32, i32) {
    %c0_i32 = arith.constant 0 : i32
    %c0_i32_0 = arith.constant 0 : i32
    %c0_i32_1 = arith.constant 0 : i32
    return %c0_i32, %c0_i32_0 : i32, i32
  }
  func.func @transform_5(%arg0: i32, %arg1: memref<1xf32, #tpu.memory_space<smem>>) -> (i32, i32) {
    %c0_i32 = arith.constant 0 : i32
    %c0_i32_0 = arith.constant 0 : i32
    %c0_i32_1 = arith.constant 0 : i32
    return %c0_i32, %c0_i32_0 : i32, i32
  }
  func.func @transform_6(%arg0: i32, %arg1: memref<1xf32, #tpu.memory_space<smem>>) -> (i32, i32) {
    %c0_i32 = arith.constant 0 : i32
    %c0_i32_0 = arith.constant 0 : i32
    %c0_i32_1 = arith.constant 0 : i32
    return %c0_i32, %c0_i32_0 : i32, i32
  }
  func.func @transform_7(%arg0: i32, %arg1: memref<1xf32, #tpu.memory_space<smem>>) -> (i32, i32) {
    %c0_i32 = arith.constant 0 : i32
    %c0_i32_0 = arith.constant 0 : i32
    return %c0_i32, %arg0 : i32, i32
  }
}

</mosaic_0001>

<bundles_post_ra>
// kernel: tpu_custom_call.1
= control target key start
LH: loop header
LB: loop body
LE: loop exit
PB: predicated region body
PF: predicated region fallthrough
CT: control target
= control target key end

     0   :  { %14 = vsyncpa [#allocation5], 0  ;;  %s1498_s0 = inlined_call_operand.<no memory space> [shape: f32[1], index: 0, kind: input, shape index: {}]   ;;  %s1499_s1 = inlined_call_operand.vmem [shape: f32[128,32], index: 1, kind: input, shape index: {}]   ;;  %s1500_s2 = inlined_call_operand.vmem [shape: f32[128,32], index: 2, kind: input, shape index: {}]   ;;  %s1501_s3 = inlined_call_operand.vmem [shape: f32[1,32], index: 3, kind: input, shape index: {}]   ;;  %s1502_s4 = inlined_call_operand.vmem [shape: f32[128,128], index: 4, kind: input, shape index: {}]   ;;  %s1503_s5 = inlined_call_operand.vmem [shape: f32[128,128], index: 5, kind: input, shape index: {}]   ;;  %s1504_s6 = inlined_call_operand.hbm [shape: f32[128,128], index: 6, kind: input, shape index: {}]   ;;  %s1505_s7 = inlined_call_operand.vmem [shape: f32[1,128], index: 7, kind: input, shape index: {}]   ;;  %s1506_s8 = inlined_call_operand.hbm [shape: f32[16,128], index: 8, kind: output, shape index: {}]  }
   0x1   :  { %15 = vsyncpa [#allocation6], 0  ;;  %s860_s27 = smov [#allocation4]   ;;  %s812_s9 = scalar_lea.hbm %s1504_s6, 2048 }
   0x2   :  { %s31_s28 = sshll.u32 %s860_s27, 4  ;;  %p813_p0 = scmp.ne.s32.totalorder %s1504_s6, %s812_s9  ;;  %s32_s28 = int_to_ptr.vmem [resolvable:$true] %s31_s28 }
   0x3   :  { %p816_p1 = scmp.lt.u32.totalorder %s812_s9, %s1504_s6 }
   0x5   :  { %p818_p2 = pnand %p816_p1, %p813_p0 }
   0x7   :  { %821 = shalt.err (!%p818_p2)
}
   0x8   :  { %s822_s14 = scalar_lea.vmem %s32_s28, 2048  ;;  %p827_p4 = scmp.lt.s32.totalorder %s32_s28, %s32_s28 }
   0x9   :  { %p823_p3 = scmp.ne.s32.totalorder %s32_s28, %s822_s14  ;;  %p828_p5 = scmp.lt.s32.totalorder %s822_s14, %s822_s14 }
   0xb   :  { %p829_p6 = por %p828_p5, %p827_p4 }
   0xd   :  { %p830_p7 = pnand %p829_p6, %p823_p3 }
   0xf   :  { %833 = shalt.err (!%p830_p7)
}
  0x10   :  { %s861_s15 = smov 128   ;;  %s862_s16 = smov 8  }
  0x11   :  { %37 = dma.hbm_to_vmem [thread:$0]  %s1504_s6, 2048, %s32_s28, [#allocation5], %s861_s15, %s861_s15, %s862_s16  }
  0x12   :  { %856 = dma.done.wait [#allocation5], 2048  }
  0x13   :  { %857 = vsyncadd [#allocation5], 4294965248  ;;  %v44_v0 = vld [vmem:[%s1499_s1] sm:$0xff]  ;;  %v46_v4 = vld [vmem:[%s1499_s1 + $0x10] sm:$0xff]  ;;  %vm131_vm0 = vcmask 261120  }
  0x14   :  { %v60_v1 = vld [vmem:[%s1500_s2] sm:$0xff]  ;;  %v62_v5 = vld [vmem:[%s1500_s2 + $0x10] sm:$0xff]  ;;  %v45_v6 = vld [vmem:[%s1499_s1 + $0x8] sm:$0xff] }
  0x15   :  { %v933_v2 = vld [vmem:[%s1501_s3] ss:$0 sm:$0xff]  ;;  %v76_v3 = vmul.f32 0.05, %v60_v1  ;;  %v78_v7 = vmul.f32 0.05, %v62_v5 }
  0x16   :  { %v61_v8 = vld [vmem:[%s1500_s2 + $0x8] sm:$0xff]  ;;  %v47_v9 = vld [vmem:[%s1499_s1 + $0x18] sm:$0xff]  ;;  %v48_v14 = vld [vmem:[%s1499_s1 + $0x20] sm:$0xff] }
  0x17   :  { %v63_v10 = vld [vmem:[%s1500_s2 + $0x18] sm:$0xff]  ;;  %v92_v11 = vadd.f32 %v76_v3, %v44_v0  ;;  %v77_v12 = vmul.f32 0.05, %v61_v8  ;;  %v64_v15 = vld [vmem:[%s1500_s2 + $0x20] sm:$0xff]  ;;  %v94_v16 = vadd.f32 %v78_v7, %v46_v4  ;;  %v49_v18 = vld [vmem:[%s1499_s1 + $0x28] sm:$0xff] }
  0x18   :  { %v79_v13 = vmul.f32 0.05, %v63_v10  ;;  %v80_v17 = vmul.f32 0.05, %v64_v15  ;;  %v65_v19 = vld [vmem:[%s1500_s2 + $0x28] sm:$0xff]  ;;  %v66_v24 = vld [vmem:[%s1500_s2 + $0x30] sm:$0xff] }
  0x19   :  { %v115_v20 = vmul.f32 %v933_v2, %v92_v11  ;;  %v93_v21 = vadd.f32 %v77_v12, %v45_v6  ;;  %v81_v23 = vmul.f32 0.05, %v65_v19  ;;  %v67_v25 = vld [vmem:[%s1500_s2 + $0x38] sm:$0xff]  ;;  %v117_v26 = vmul.f32 %v933_v2, %v94_v16  ;;  %v50_v28 = vld [vmem:[%s1499_s1 + $0x30] sm:$0xff]  ;;  %v68_v31 = vld [vmem:[%s1500_s2 + $0x40] sm:$0xff] }
  0x1a   :  { %v95_v22 = vadd.f32 %v79_v13, %v47_v9  ;;  %v96_v27 = vadd.f32 %v80_v17, %v48_v14  ;;  %v82_v29 = vmul.f32 0.05, %v66_v24  ;;  %v83_v30 = vmul.f32 0.05, %v67_v25  ;;  %v51_v36 = vld [vmem:[%s1499_s1 + $0x38] sm:$0xff]  ;;  %v69_v37 = vld [vmem:[%s1500_s2 + $0x48] sm:$0xff] }
  0x1b   :  { %v132_v32 = vsel %vm131_vm0, %v115_v20, 0.0  ;;  %v116_v33 = vmul.f32 %v933_v2, %v93_v21  ;;  %v97_v35 = vadd.f32 %v81_v23, %v49_v18  ;;  %v138_v38 = vsel %vm131_vm0, %v117_v26, 0.0  ;;  %v52_v46 = vld [vmem:[%s1499_s1 + $0x40] sm:$0xff]  ;;  %v70_v48 = vld [vmem:[%s1500_s2 + $0x50] sm:$0xff]  ;;  %v53_v49 = vld [vmem:[%s1499_s1 + $0x48] sm:$0xff] }
  0x1c   :  { %v118_v34 = vmul.f32 %v933_v2, %v95_v22  ;;  %133 = vadd.xlane.f32.xlu0 %v132_v32  ;;  %139 = vadd.xlane.f32.xlu1 %v138_v38  ;;  %v119_v40 = vmul.f32 %v933_v2, %v96_v27  ;;  %v98_v41 = vadd.f32 %v82_v29, %v50_v28  ;;  %v84_v42 = vmul.f32 0.05, %v68_v31  ;;  %v71_v50 = vld [vmem:[%s1500_s2 + $0x58] sm:$0xff]  ;;  %v54_v58 = vld [vmem:[%s1499_s1 + $0x50] sm:$0xff]  ;;  %v72_v60 = vld [vmem:[%s1500_s2 + $0x60] sm:$0xff] }
  0x1d   :  { %v135_v39 = vsel %vm131_vm0, %v116_v33, 0.0  ;;  %v120_v44 = vmul.f32 %v933_v2, %v97_v35  ;;  %v99_v45 = vadd.f32 %v83_v30, %v51_v36  ;;  %v85_v47 = vmul.f32 0.05, %v69_v37  ;;  %v55_v61 = vld [vmem:[%s1499_s1 + $0x58] sm:$0xff]  ;;  %v73_v62 = vld [vmem:[%s1500_s2 + $0x68] sm:$0xff]  ;;  %v56_v7 = vld [vmem:[%s1499_s1 + $0x60] sm:$0xff] }
  0x1e   :  { %v141_v43 = vsel %vm131_vm0, %v118_v34, 0.0  ;;  %v144_v51 = vsel %vm131_vm0, %v119_v40, 0.0  ;;  %v121_v52 = vmul.f32 %v933_v2, %v98_v41  ;;  %v100_v53 = vadd.f32 %v84_v42, %v52_v46  ;;  %v74_v9 = vld [vmem:[%s1500_s2 + $0x70] sm:$0xff]  ;;  %v57_v10 = vld [vmem:[%s1499_s1 + $0x68] sm:$0xff]  ;;  %v75_v11 = vld [vmem:[%s1500_s2 + $0x78] sm:$0xff] }
  0x1f   :  { %v86_v54 = vmul.f32 0.05, %v70_v48  ;;  %v147_v55 = vsel %vm131_vm0, %v120_v44, 0.0  ;;  %v122_v56 = vmul.f32 %v933_v2, %v99_v45  ;;  %v101_v57 = vadd.f32 %v85_v47, %v53_v49  ;;  %v58_v19 = vld [vmem:[%s1499_s1 + $0x70] sm:$0xff]  ;;  %v59_v21 = vld [vmem:[%s1499_s1 + $0x78] sm:$0xff]  ;;  %v214_v38 = vld [vmem:[%s1502_s4 + $0x8] sm:$0xff] }
  0x20   :  { %136 = vadd.xlane.f32.xlu0 %v135_v39  ;;  %142 = vadd.xlane.f32.xlu1 %v141_v43  ;;  %v87_v59 = vmul.f32 0.05, %v71_v50  ;;  %v150_v63 = vsel %vm131_vm0, %v121_v52, 0.0  ;;  %v123_v0 = vmul.f32 %v933_v2, %v100_v53  ;;  %v88_v3 = vmul.f32 0.05, %v72_v60  ;;  %v215_v43 = vld [vmem:[%s1502_s4 + $0x10] sm:$0xff] }
  0x21   :  { %v102_v1 = vadd.f32 %v86_v54, %v54_v58  ;;  %v153_v4 = vsel %vm131_vm0, %v122_v56, 0.0  ;;  %v124_v5 = vmul.f32 %v933_v2, %v101_v57  ;;  %v89_v8 = vmul.f32 0.05, %v73_v62  ;;  %v216_v44 = vld [vmem:[%s1502_s4 + $0x18] sm:$0xff]  ;;  %v217_v48 = vld [vmem:[%s1502_s4 + $0x20] sm:$0xff] }
  0x22   :  { %v103_v6 = vadd.f32 %v87_v59, %v55_v61  ;;  %v156_v12 = vsel %vm131_vm0, %v123_v0, 0.0  ;;  %v104_v14 = vadd.f32 %v88_v3, %v56_v7  ;;  %v90_v15 = vmul.f32 0.05, %v74_v9  ;;  %v219_v59 = vld [vmem:[%s1502_s4 + $0x30] sm:$0xff] }
  0x23   :  { %v125_v13 = vmul.f32 %v933_v2, %v102_v1  ;;  %v159_v16 = vsel %vm131_vm0, %v124_v5, 0.0  ;;  %v105_v18 = vadd.f32 %v89_v8, %v57_v10  ;;  %v91_v20 = vmul.f32 0.05, %v75_v11  ;;  %v220_v1 = vld [vmem:[%s1502_s4 + $0x38] sm:$0xff] }
  0x24   :  { %145 = vadd.xlane.f32.xlu0 %v144_v51  ;;  %148 = vadd.xlane.f32.xlu1 %v147_v55  ;;  %v126_v17 = vmul.f32 %v933_v2, %v103_v6  ;;  %v127_v23 = vmul.f32 %v933_v2, %v104_v14  ;;  %v106_v24 = vadd.f32 %v90_v15, %v58_v19  ;;  %v1060_v34 = vstv %s1498_s0  ;;  %v218_v55 = vld [vmem:[%s1502_s4 + $0x28] sm:$0xff]  ;;  %v221_v6 = vld [vmem:[%s1502_s4 + $0x40] sm:$0xff] }
  0x25   :  { %v162_v22 = vsel %vm131_vm0, %v125_v13, 0.0  ;;  %v128_v26 = vmul.f32 %v933_v2, %v105_v18  ;;  %v107_v27 = vadd.f32 %v91_v20, %v59_v21 }
  0x26   :  { %v165_v25 = vsel %vm131_vm0, %v126_v17, 0.0  ;;  %v168_v28 = vsel %vm131_vm0, %v127_v23, 0.0  ;;  %v129_v29 = vmul.f32 %v933_v2, %v106_v24 }
  0x27   :  { %v171_v30 = vsel %vm131_vm0, %v128_v26, 0.0  ;;  %v130_v31 = vmul.f32 %v933_v2, %v107_v27  ;;  %v213_v2 = vld [vmem:[%s1502_s4] sm:$0xff] }
  0x28   :  { %151 = vadd.xlane.f32.xlu0 %v150_v63  ;;  %154 = vadd.xlane.f32.xlu1 %v153_v4  ;;  %v174_v32 = vsel %vm131_vm0, %v129_v29, 0.0  ;;  %v225_v26 = vld [vmem:[%s1502_s4 + $0x60] sm:$0xff] }
  0x29   :  { %v177_v33 = vsel %vm131_vm0, %v130_v31, 0.0 }
  0x2c   :  { %157 = vadd.xlane.f32.xlu0 %v156_v12  ;;  %160 = vadd.xlane.f32.xlu1 %v159_v16  ;;  %v222_v12 = vld [vmem:[%s1502_s4 + $0x48] sm:$0xff]  ;;  %v223_v16 = vld [vmem:[%s1502_s4 + $0x50] sm:$0xff] }
  0x30   :  { %163 = vadd.xlane.f32.xlu0 %v162_v22  ;;  %166 = vadd.xlane.f32.xlu1 %v165_v25  ;;  %v224_v22 = vld [vmem:[%s1502_s4 + $0x58] sm:$0xff] }
  0x34   :  { %169 = vadd.xlane.f32.xlu0 %v168_v28  ;;  %172 = vadd.xlane.f32.xlu1 %v171_v30 }
  0x38   :  { %175 = vadd.xlane.f32.xlu0 %v174_v32  ;;  %178 = vadd.xlane.f32.xlu1 %v177_v33  ;;  %v226_v32 = vld [vmem:[%s1502_s4 + $0x68] sm:$0xff] }
  0xa9   :  { %v134_v35 = vpop.xlane.xlu0 %133  ;;  %v140_v36 = vpop.xlane.xlu1 %139 }
  0xaa   :  { %v1063_v37 = vadd.f32 %v1060_v34, %v134_v35  ;;  %v1072_v40 = vadd.f32 %v1060_v34, %v140_v36 }
  0xac   :  { %v229_v46 = vmul.f32 %v213_v2, %v1063_v37  ;;  %v231_v50 = vmul.f32 %v215_v43, %v1072_v40  ;;  %v227_v2 = vld [vmem:[%s1502_s4 + $0x70] sm:$0xff] }
  0xad   :  { %v137_v39 = vpop.xlane.xlu0 %136  ;;  %v143_v42 = vpop.xlane.xlu1 %142 }
  0xae   :  { %v1075_v41 = vadd.f32 %v1060_v34, %v137_v39  ;;  %v1084_v45 = vadd.f32 %v1060_v34, %v143_v42 }
  0xb0   :  { %v230_v47 = vmul.f32 %v214_v38, %v1075_v41  ;;  %v232_v52 = vmul.f32 %v216_v44, %v1084_v45 }
  0xb1   :  { %v146_v49 = vpop.xlane.xlu0 %145  ;;  %v149_v54 = vpop.xlane.xlu1 %148 }
  0xb2   :  { %v245_v51 = vadd.f32 %v230_v47, %v229_v46  ;;  %v1094_v53 = vadd.f32 %v1060_v34, %v146_v49  ;;  %v1100_v56 = vadd.f32 %v1060_v34, %v149_v54  ;;  %v228_v46 = vld [vmem:[%s1502_s4 + $0x78] sm:$0xff] }
  0xb4   :  { %v246_v57 = vadd.f32 %v245_v51, %v231_v50  ;;  %v233_v58 = vmul.f32 %v217_v48, %v1094_v53  ;;  %v234_v62 = vmul.f32 %v218_v55, %v1100_v56 }
  0xb5   :  { %v152_v60 = vpop.xlane.xlu0 %151  ;;  %v155_v0 = vpop.xlane.xlu1 %154 }
  0xb6   :  { %v247_v61 = vadd.f32 %v246_v57, %v232_v52  ;;  %v1108_v63 = vadd.f32 %v1060_v34, %v152_v60  ;;  %v1114_v3 = vadd.f32 %v1060_v34, %v155_v0  ;;  %v314_v0 = vld [vmem:[#allocation4] sm:$0xff] }
  0xb8   :  { %v248_v4 = vadd.f32 %v247_v61, %v233_v58  ;;  %v235_v5 = vmul.f32 %v219_v59, %v1108_v63  ;;  %v236_v9 = vmul.f32 %v220_v1, %v1114_v3  ;;  %v1188_v1 = vld [vmem:[%s1503_s5] sm:$0xff] }
  0xb9   :  { %v158_v7 = vpop.xlane.xlu0 %157  ;;  %v161_v11 = vpop.xlane.xlu1 %160 }
  0xba   :  { %v249_v8 = vadd.f32 %v248_v4, %v234_v62  ;;  %v1122_v10 = vadd.f32 %v1060_v34, %v158_v7  ;;  %v1128_v13 = vadd.f32 %v1060_v34, %v161_v11  ;;  %v315_v62 = vld [vmem:[#allocation4 + $0x8] sm:$0xff]  ;;  %v317_v4 = vld [vmem:[#allocation4 + $0x18] sm:$0xff] }
  0xbc   :  { %v250_v14 = vadd.f32 %v249_v8, %v235_v5  ;;  %v237_v15 = vmul.f32 %v221_v6, %v1122_v10  ;;  %v238_v19 = vmul.f32 %v222_v12, %v1128_v13 }
  0xbd   :  { %v164_v17 = vpop.xlane.xlu0 %163  ;;  %v167_v21 = vpop.xlane.xlu1 %166 }
  0xbe   :  { %v251_v18 = vadd.f32 %v250_v14, %v236_v9  ;;  %v1136_v20 = vadd.f32 %v1060_v34, %v164_v17  ;;  %v1142_v23 = vadd.f32 %v1060_v34, %v167_v21  ;;  %v316_v9 = vld [vmem:[#allocation4 + $0x10] sm:$0xff]  ;;  %v1199_v14 = vld [vmem:[%s1503_s5 + $0x18] sm:$0xff]  ;;  %v319_v21 = vld [vmem:[#allocation4 + $0x28] sm:$0xff] }
  0xbf   :  { %v1209_v17 = vld [vmem:[%s1503_s5 + $0x10] sm:$0xff] }
  0xc0   :  { %v252_v24 = vadd.f32 %v251_v18, %v237_v15  ;;  %v239_v25 = vmul.f32 %v223_v16, %v1136_v20  ;;  %v240_v29 = vmul.f32 %v224_v22, %v1142_v23  ;;  %v318_v22 = vld [vmem:[#allocation4 + $0x20] sm:$0xff] }
  0xc1   :  { %v170_v27 = vpop.xlane.xlu0 %169  ;;  %v173_v31 = vpop.xlane.xlu1 %172 }
  0xc2   :  { %v253_v28 = vadd.f32 %v252_v24, %v238_v19  ;;  %v1150_v30 = vadd.f32 %v1060_v34, %v170_v27  ;;  %v1156_v33 = vadd.f32 %v1060_v34, %v173_v31  ;;  %v1221_v24 = vld [vmem:[%s1503_s5 + $0x28] sm:$0xff] }
  0xc4   :  { %v254_v35 = vadd.f32 %v253_v28, %v239_v25  ;;  %v241_v36 = vmul.f32 %v225_v26, %v1150_v30  ;;  %v242_v42 = vmul.f32 %v226_v32, %v1156_v33  ;;  %v1231_v28 = vld [vmem:[%s1503_s5 + $0x20] sm:$0xff] }
  0xc5   :  { %v176_v38 = vpop.xlane.xlu0 %175  ;;  %v179_v44 = vpop.xlane.xlu1 %178 }
  0xc6   :  { %v255_v39 = vadd.f32 %v254_v35, %v240_v29  ;;  %v1164_v43 = vadd.f32 %v1060_v34, %v176_v38  ;;  %v1170_v47 = vadd.f32 %v1060_v34, %v179_v44  ;;  %v1179_v34 = vld [vmem:[%s1503_s5 + $0x8] sm:$0xff]  ;;  %v321_v35 = vld [vmem:[#allocation4 + $0x38] sm:$0xff]  ;;  %v1253_v44 = vld [vmem:[%s1503_s5 + $0x30] sm:$0xff] }
  0xc8   :  { %v256_v48 = vadd.f32 %v255_v39, %v241_v36  ;;  %v243_v49 = vmul.f32 %v227_v2, %v1164_v43  ;;  %v244_v51 = vmul.f32 %v228_v46, %v1170_v47  ;;  %v320_v36 = vld [vmem:[#allocation4 + $0x30] sm:$0xff]  ;;  %v1247_v2 = vld [vmem:[%s1503_s5 + $0x38] sm:$0xff] }
  0xca   :  { %v257_v50 = vadd.f32 %v256_v48, %v242_v42 }
  0xcc   :  { %v258_v52 = vadd.f32 %v257_v50, %v243_v49  ;;  %v323_v50 = vld [vmem:[#allocation4 + $0x48] sm:$0xff] }
  0xce   :  { %v259_v54 = vadd.f32 %v258_v52, %v244_v51  ;;  %v322_v51 = vld [vmem:[#allocation4 + $0x40] sm:$0xff]  ;;  %v1267_v52 = vld [vmem:[%s1503_s5 + $0x48] sm:$0xff] }
  0xd0   :  { %v260_v55 = vrot.slane %v259_v54, 4 }
  0xd2   :  { %v261_v57 = vadd.f32 %v260_v55, %v259_v54 }
  0xd4   :  { %v262_v58 = vrot.slane %v261_v57, 2 }
  0xd6   :  { %v263_v59 = vadd.f32 %v262_v58, %v261_v57  ;;  %v1273_v58 = vld [vmem:[%s1503_s5 + $0x40] sm:$0xff] }
  0xd8   :  { %v264_v60 = vrot.slane %v263_v59, 1 }
  0xda   :  { %v1174_v61 = vadd.f32 %v264_v60, %v263_v59 }
  0xdc   :  { %vm267_vm1 = vcmp.gt.f32.partialorder %v1174_v61, %v1075_v41  ;;  %vm283_vm2 = vcmp.eq.f32.partialorder %v1174_v61, %v1075_v41  ;;  %vm266_vm3 = vcmp.gt.f32.partialorder %v1174_v61, %v1063_v37  ;;  %vm282_vm4 = vcmp.eq.f32.partialorder %v1174_v61, %v1063_v37 }
  0xdd   :  { %v299_v5 = vsel %vm267_vm1, %v1179_v34, 0.0  ;;  %v331_v6 = vsel %vm283_vm2, %v315_v62, 0.0  ;;  %v298_v7 = vsel %vm266_vm3, %v1188_v1, 0.0  ;;  %v330_v8 = vsel %vm282_vm4, %v314_v0, 0.0  ;;  %v325_v0 = vld [vmem:[#allocation4 + $0x58] sm:$0xff] }
  0xde   :  { %v347_v11 = vadd.f32 %v331_v6, %v299_v5  ;;  %v346_v12 = vadd.f32 %v330_v8, %v298_v7  ;;  %vm269_vm5 = vcmp.gt.f32.partialorder %v1174_v61, %v1084_v45  ;;  %vm285_vm6 = vcmp.eq.f32.partialorder %v1174_v61, %v1084_v45  ;;  %v1287_v5 = vld [vmem:[%s1503_s5 + $0x58] sm:$0xff] }
  0xdf   :  { %v301_v15 = vsel %vm269_vm5, %v1199_v14, 0.0  ;;  %v333_v16 = vsel %vm285_vm6, %v317_v4, 0.0  ;;  %vm268_vm7 = vcmp.gt.f32.partialorder %v1174_v61, %v1072_v40  ;;  %vm284_vm8 = vcmp.eq.f32.partialorder %v1174_v61, %v1072_v40  ;;  %v324_v4 = vld [vmem:[#allocation4 + $0x50] sm:$0xff] }
  0xe0   :  { %364 = vadd.xlane.f32.xlu1 %v347_v11  ;;  %362 = vadd.xlane.f32.xlu0 %v346_v12  ;;  %v300_v18 = vsel %vm268_vm7, %v1209_v17, 0.0  ;;  %v332_v19 = vsel %vm284_vm8, %v316_v9, 0.0  ;;  %vm271_vm9 = vcmp.gt.f32.partialorder %v1174_v61, %v1100_v56  ;;  %vm287_vm10 = vcmp.eq.f32.partialorder %v1174_v61, %v1100_v56  ;;  %v1293_v9 = vld [vmem:[%s1503_s5 + $0x50] sm:$0xff] }
  0xe1   :  { %vm270_vm11 = vcmp.gt.f32.partialorder %v1174_v61, %v1094_v53  ;;  %v349_v25 = vadd.f32 %v333_v16, %v301_v15  ;;  %v348_v26 = vadd.f32 %v332_v19, %v300_v18  ;;  %v303_v27 = vsel %vm271_vm9, %v1221_v24, 0.0  ;;  %v327_v16 = vld [vmem:[#allocation4 + $0x68] sm:$0xff]  ;;  %v326_v18 = vld [vmem:[#allocation4 + $0x60] sm:$0xff] }
  0xe2   :  { %vm286_vm12 = vcmp.eq.f32.partialorder %v1174_v61, %v1094_v53  ;;  %v335_v29 = vsel %vm287_vm10, %v319_v21, 0.0  ;;  %v302_v31 = vsel %vm270_vm11, %v1231_v28, 0.0  ;;  %vm273_vm13 = vcmp.gt.f32.partialorder %v1174_v61, %v1114_v3  ;;  %v1307_v19 = vld [vmem:[%s1503_s5 + $0x68] sm:$0xff] }
  0xe3   :  { %v334_v32 = vsel %vm286_vm12, %v318_v22, 0.0  ;;  %vm289_vm14 = vcmp.eq.f32.partialorder %v1174_v61, %v1114_v3  ;;  %vm272_vm15 = vcmp.gt.f32.partialorder %v1174_v61, %v1108_v63  ;;  %vm288_vm0 = vcmp.eq.f32.partialorder %v1174_v61, %v1108_v63 }
  0xe4   :  { %368 = vadd.xlane.f32.xlu1 %v349_v25  ;;  %366 = vadd.xlane.f32.xlu0 %v348_v26  ;;  %v351_v38 = vadd.f32 %v335_v29, %v303_v27  ;;  %v350_v39 = vadd.f32 %v334_v32, %v302_v31  ;;  %v305_v42 = vsel %vm273_vm13, %v1247_v2, 0.0  ;;  %v337_v46 = vsel %vm289_vm14, %v321_v35, 0.0  ;;  %v1313_v26 = vld [vmem:[%s1503_s5 + $0x60] sm:$0xff]  ;;  %v329_v32 = vld [vmem:[#allocation4 + $0x78] sm:$0xff]  ;;  %v328_v35 = vld [vmem:[#allocation4 + $0x70] sm:$0xff] }
  0xe5   :  { %v304_v48 = vsel %vm272_vm15, %v1253_v44, 0.0  ;;  %v336_v49 = vsel %vm288_vm0, %v320_v36, 0.0  ;;  %vm275_vm1 = vcmp.gt.f32.partialorder %v1174_v61, %v1128_v13  ;;  %vm291_vm2 = vcmp.eq.f32.partialorder %v1174_v61, %v1128_v13 }
  0xe6   :  { %vm274_vm3 = vcmp.gt.f32.partialorder %v1174_v61, %v1122_v10  ;;  %vm290_vm4 = vcmp.eq.f32.partialorder %v1174_v61, %v1122_v10  ;;  %v353_v54 = vadd.f32 %v337_v46, %v305_v42  ;;  %v352_v55 = vadd.f32 %v336_v49, %v304_v48  ;;  %v1332_v42 = vld [vmem:[%s1503_s5 + $0x70] sm:$0xff] }
  0xe7   :  { %v307_v57 = vsel %vm275_vm1, %v1267_v52, 0.0  ;;  %v339_v59 = vsel %vm291_vm2, %v323_v50, 0.0  ;;  %v306_v60 = vsel %vm274_vm3, %v1273_v58, 0.0  ;;  %v338_v62 = vsel %vm290_vm4, %v322_v51, 0.0 }
  0xe8   :  { %372 = vadd.xlane.f32.xlu1 %v351_v38  ;;  %370 = vadd.xlane.f32.xlu0 %v350_v39  ;;  %vm277_vm5 = vcmp.gt.f32.partialorder %v1174_v61, %v1142_v23  ;;  %vm293_vm6 = vcmp.eq.f32.partialorder %v1174_v61, %v1142_v23  ;;  %vm276_vm7 = vcmp.gt.f32.partialorder %v1174_v61, %v1136_v20  ;;  %v1327_v39 = vld [vmem:[%s1503_s5 + $0x78] sm:$0xff]  ;;  %s863_s5 = smov [#allocation7]  }
  0xe9   :  { %vm292_vm8 = vcmp.eq.f32.partialorder %v1174_v61, %v1136_v20  ;;  %v355_v6 = vadd.f32 %v339_v59, %v307_v57  ;;  %v354_v7 = vadd.f32 %v338_v62, %v306_v60  ;;  %v309_v8 = vsel %vm277_vm5, %v1287_v5, 0.0 }
  0xea   :  { %v341_v11 = vsel %vm293_vm6, %v325_v0, 0.0  ;;  %v308_v12 = vsel %vm276_vm7, %v1293_v9, 0.0  ;;  %v340_v15 = vsel %vm292_vm8, %v324_v4, 0.0  ;;  %vm279_vm9 = vcmp.gt.f32.partialorder %v1174_v61, %v1156_v33 }
  0xeb   :  { %vm295_vm10 = vcmp.eq.f32.partialorder %v1174_v61, %v1156_v33  ;;  %vm278_vm11 = vcmp.gt.f32.partialorder %v1174_v61, %v1150_v30  ;;  %vm294_vm12 = vcmp.eq.f32.partialorder %v1174_v61, %v1150_v30  ;;  %v357_v21 = vadd.f32 %v341_v11, %v309_v8 }
  0xec   :  { %376 = vadd.xlane.f32.xlu1 %v353_v54  ;;  %374 = vadd.xlane.f32.xlu0 %v352_v55  ;;  %v356_v22 = vadd.f32 %v340_v15, %v308_v12  ;;  %v311_v25 = vsel %vm279_vm9, %v1307_v19, 0.0  ;;  %v343_v27 = vsel %vm295_vm10, %v327_v16, 0.0  ;;  %v310_v29 = vsel %vm278_vm11, %v1313_v26, 0.0  ;;  %v1339_v54 = vld [vmem:[%s1505_s7] ss:$0 sm:$0xff]  ;;  %s760_s7 = sshll.u32 %s863_s5, 4  ;;  %s761_s7 = int_to_ptr.vmem [resolvable:$true] %s760_s7 }
  0xed   :  { %v342_v31 = vsel %vm294_vm12, %v326_v18, 0.0  ;;  %vm281_vm13 = vcmp.gt.f32.partialorder %v1174_v61, %v1170_v47  ;;  %vm297_vm14 = vcmp.eq.f32.partialorder %v1174_v61, %v1170_v47  ;;  %vm280_vm15 = vcmp.gt.f32.partialorder %v1174_v61, %v1164_v43  ;;  %s834_s9 = scalar_lea.vmem %s761_s7, 256  ;;  %p839_p9 = scmp.lt.s32.totalorder %s761_s7, %s761_s7 }
  0xee   :  { %vm296_vm0 = vcmp.eq.f32.partialorder %v1174_v61, %v1164_v43  ;;  %v359_v36 = vadd.f32 %v343_v27, %v311_v25  ;;  %v358_v38 = vadd.f32 %v342_v31, %v310_v29  ;;  %v313_v46 = vsel %vm281_vm13, %v1327_v39, 0.0  ;;  %p835_p8 = scmp.ne.s32.totalorder %s761_s7, %s834_s9  ;;  %p840_p10 = scmp.lt.s32.totalorder %s834_s9, %s834_s9 }
  0xef   :  { %v345_v48 = vsel %vm297_vm14, %v329_v32, 0.0  ;;  %v312_v49 = vsel %vm280_vm15, %v1332_v42, 0.0  ;;  %v344_v50 = vsel %vm296_vm0, %v328_v35, 0.0  ;;  %v418_v55 = vmul.f32 %v1179_v34, %v1075_v41 }
  0xf0   :  { %380 = vadd.xlane.f32.xlu1 %v355_v6  ;;  %378 = vadd.xlane.f32.xlu0 %v354_v7  ;;  %v361_v61 = vadd.f32 %v345_v48, %v313_v46  ;;  %v360_v51 = vadd.f32 %v344_v50, %v312_v49  ;;  %v417_v59 = vmul.f32 %v1188_v1, %v1063_v37  ;;  %p841_p11 = por %p840_p10, %p839_p9 }
  0xf1   :  { %v419_v6 = vmul.f32 %v1209_v17, %v1072_v40  ;;  %v420_v11 = vmul.f32 %v1199_v14, %v1084_v45  ;;  %v422_v27 = vmul.f32 %v1221_v24, %v1100_v56  ;;  %v424_v48 = vmul.f32 %v1247_v2, %v1114_v3 }
  0xf2   :  { %p842_p12 = pnand %p841_p11, %p835_p8 }
  0xf4   :  { %384 = vadd.xlane.f32.xlu1 %v357_v21  ;;  %382 = vadd.xlane.f32.xlu0 %v356_v22  ;;  %v421_v21 = vmul.f32 %v1231_v28, %v1094_v53 }
  0xf8   :  { %388 = vadd.xlane.f32.xlu1 %v359_v36  ;;  %386 = vadd.xlane.f32.xlu0 %v358_v38  ;;  %v423_v36 = vmul.f32 %v1253_v44, %v1108_v63 }
  0xfc   :  { %392 = vadd.xlane.f32.xlu1 %v361_v61  ;;  %390 = vadd.xlane.f32.xlu0 %v360_v51 }
 0x16d   :  { %v365_v57 = vpop.xlane.xlu1 %364  ;;  %v363_v60 = vpop.xlane.xlu0 %362 }
 0x16e   :  { %vm402_vm1 = vcmp.eq.f32.partialorder %v365_v57, %v1339_v54  ;;  %vm401_vm2 = vcmp.eq.f32.partialorder %v363_v60, %v1339_v54  ;;  %v426_v60 = vmul.f32 %v1267_v52, %v1128_v13 }
 0x16f   :  { %v434_v62 = vsel %vm402_vm1, %v418_v55, 0.0  ;;  %v433_v0 = vsel %vm401_vm2, %v417_v59, 0.0  ;;  %v425_v55 = vmul.f32 %v1273_v58, %v1122_v10  ;;  %vm717_vm1 = vcmask 1041409  }
 0x170   :  { %v449_v8 = vadd.f32 %v434_v62, %v433_v0  ;;  %vm720_vm2 = vcmask 1042434  }
 0x171   :  { %v369_v4 = vpop.xlane.xlu1 %368  ;;  %v367_v7 = vpop.xlane.xlu0 %366 }
 0x172   :  { %vm404_vm3 = vcmp.eq.f32.partialorder %v369_v4, %v1339_v54  ;;  %vm403_vm4 = vcmp.eq.f32.partialorder %v367_v7, %v1339_v54  ;;  %v427_v7 = vmul.f32 %v1293_v9, %v1136_v20 }
 0x173   :  { %v435_v12 = vsel %vm403_vm4, %v419_v6, 0.0  ;;  %v436_v16 = vsel %vm404_vm3, %v420_v11, 0.0  ;;  %vm723_vm3 = vcmask 1043459   ;;  %vm726_vm4 = vcmask 1044484  }
 0x174   :  { %v450_v15 = vadd.f32 %v449_v8, %v435_v12  ;;  %v428_v12 = vmul.f32 %v1287_v5, %v1142_v23 }
 0x175   :  { %v373_v18 = vpop.xlane.xlu1 %372  ;;  %v371_v22 = vpop.xlane.xlu0 %370 }
 0x176   :  { %vm406_vm5 = vcmp.eq.f32.partialorder %v373_v18, %v1339_v54  ;;  %v451_v25 = vadd.f32 %v450_v15, %v436_v16  ;;  %vm405_vm6 = vcmp.eq.f32.partialorder %v371_v22, %v1339_v54  ;;  %v429_v22 = vmul.f32 %v1313_v26, %v1150_v30 }
 0x177   :  { %v437_v29 = vsel %vm405_vm6, %v421_v21, 0.0  ;;  %v438_v32 = vsel %vm406_vm5, %v422_v27, 0.0  ;;  %vm729_vm5 = vcmask 1045509   ;;  %vm732_vm6 = vcmask 1046534  }
 0x178   :  { %v452_v31 = vadd.f32 %v451_v25, %v437_v29  ;;  %v430_v29 = vmul.f32 %v1307_v19, %v1156_v33 }
 0x179   :  { %v377_v35 = vpop.xlane.xlu1 %376  ;;  %v375_v38 = vpop.xlane.xlu0 %374 }
 0x17a   :  { %vm408_vm7 = vcmp.eq.f32.partialorder %v377_v35, %v1339_v54  ;;  %v453_v46 = vadd.f32 %v452_v31, %v438_v32  ;;  %vm407_vm8 = vcmp.eq.f32.partialorder %v375_v38, %v1339_v54  ;;  %v431_v38 = vmul.f32 %v1332_v42, %v1164_v43 }
 0x17b   :  { %v439_v49 = vsel %vm407_vm8, %v423_v36, 0.0  ;;  %v440_v61 = vsel %vm408_vm7, %v424_v48, 0.0  ;;  %vm735_vm7 = vcmask 1047559  }
 0x17c   :  { %v454_v50 = vadd.f32 %v453_v46, %v439_v49  ;;  %v432_v49 = vmul.f32 %v1327_v39, %v1170_v47 }
 0x17d   :  { %v381_v51 = vpop.xlane.xlu1 %380  ;;  %v379_v57 = vpop.xlane.xlu0 %378 }
 0x17e   :  { %vm410_vm9 = vcmp.eq.f32.partialorder %v381_v51, %v1339_v54  ;;  %v455_v59 = vadd.f32 %v454_v50, %v440_v61  ;;  %vm409_vm10 = vcmp.eq.f32.partialorder %v379_v57, %v1339_v54 }
 0x17f   :  { %v441_v62 = vsel %vm409_vm10, %v425_v55, 0.0  ;;  %v442_v4 = vsel %vm410_vm9, %v426_v60, 0.0 }
 0x180   :  { %v456_v0 = vadd.f32 %v455_v59, %v441_v62 }
 0x181   :  { %v385_v6 = vpop.xlane.xlu1 %384  ;;  %v383_v8 = vpop.xlane.xlu0 %382 }
 0x182   :  { %vm412_vm11 = vcmp.eq.f32.partialorder %v385_v6, %v1339_v54  ;;  %v457_v11 = vadd.f32 %v456_v0, %v442_v4  ;;  %vm411_vm12 = vcmp.eq.f32.partialorder %v383_v8, %v1339_v54 }
 0x183   :  { %v443_v15 = vsel %vm411_vm12, %v427_v7, 0.0  ;;  %v444_v18 = vsel %vm412_vm11, %v428_v12, 0.0 }
 0x184   :  { %v458_v16 = vadd.f32 %v457_v11, %v443_v15 }
 0x185   :  { %v389_v21 = vpop.xlane.xlu1 %388  ;;  %v387_v25 = vpop.xlane.xlu0 %386 }
 0x186   :  { %vm414_vm13 = vcmp.eq.f32.partialorder %v389_v21, %v1339_v54  ;;  %v459_v27 = vadd.f32 %v458_v16, %v444_v18  ;;  %vm413_vm14 = vcmp.eq.f32.partialorder %v387_v25, %v1339_v54 }
 0x187   :  { %v445_v31 = vsel %vm413_vm14, %v429_v22, 0.0  ;;  %v446_v35 = vsel %vm414_vm13, %v430_v29, 0.0 }
 0x188   :  { %v460_v32 = vadd.f32 %v459_v27, %v445_v31 }
 0x189   :  { %v393_v36 = vpop.xlane.xlu1 %392  ;;  %v391_v46 = vpop.xlane.xlu0 %390 }
 0x18a   :  { %vm416_vm15 = vcmp.eq.f32.partialorder %v393_v36, %v1339_v54  ;;  %v461_v48 = vadd.f32 %v460_v32, %v446_v35  ;;  %vm415_vm0 = vcmp.eq.f32.partialorder %v391_v46, %v1339_v54 }
 0x18b   :  { %v447_v50 = vsel %vm415_vm0, %v431_v38, 0.0  ;;  %v448_v51 = vsel %vm416_vm15, %v432_v49, 0.0 }
 0x18c   :  { %v462_v61 = vadd.f32 %v461_v48, %v447_v50 }
 0x18e   :  { %v463_v55 = vadd.f32 %v462_v61, %v448_v51 }
 0x190   :  { %v464_v57 = vrot.slane %v463_v55, 4 }
 0x192   :  { %v465_v59 = vadd.f32 %v464_v57, %v463_v55 }
 0x194   :  { %v466_v60 = vrot.slane %v465_v59, 2 }
 0x196   :  { %v467_v62 = vadd.f32 %v466_v60, %v465_v59 }
 0x198   :  { %v468_v0 = vrot.slane %v467_v62, 1 }
 0x19a   :  { %v1389_v4 = vadd.f32 %v468_v0, %v467_v62 }
 0x19c   :  { %v470_v6 = vsub.f32 %v1063_v37, %v1389_v4  ;;  %v471_v54 = vsub.f32 %v1075_v41, %v1389_v4  ;;  %v472_v7 = vsub.f32 %v1072_v40, %v1389_v4  ;;  %v473_v8 = vsub.f32 %v1084_v45, %v1389_v4 }
 0x19d   :  { %v474_v11 = vsub.f32 %v1094_v53, %v1389_v4  ;;  %v475_v16 = vsub.f32 %v1100_v56, %v1389_v4  ;;  %v476_v37 = vsub.f32 %v1108_v63, %v1389_v4  ;;  %v477_v40 = vsub.f32 %v1114_v3, %v1389_v4 }
 0x19e   :  { %v486_v12 = vand.u32 2147483647, %v470_v6  ;;  %v487_v15 = vand.u32 2147483647, %v471_v54  ;;  %v488_v18 = vand.u32 2147483647, %v472_v7  ;;  %v478_v53 = vsub.f32 %v1122_v10, %v1389_v4 }
 0x19f   :  { %v489_v21 = vand.u32 2147483647, %v473_v8  ;;  %v490_v41 = vand.u32 2147483647, %v474_v11  ;;  %v491_v45 = vand.u32 2147483647, %v475_v16  ;;  %v479_v63 = vsub.f32 %v1128_v13, %v1389_v4 }
 0x1a0   :  { %v502_v22 = vmul.f32 -1.0, %v486_v12  ;;  %v503_v25 = vmul.f32 -1.0, %v487_v15  ;;  %v504_v27 = vmul.f32 -1.0, %v488_v18  ;;  %v492_v31 = vand.u32 2147483647, %v476_v37 }
 0x1a1   :  { %v505_v29 = vmul.f32 -1.0, %v489_v21  ;;  %v506_v32 = vmul.f32 -1.0, %v490_v41  ;;  %v493_v56 = vand.u32 2147483647, %v477_v40  ;;  %v507_v38 = vmul.f32 -1.0, %v491_v45 }
 0x1a2   :  { %v518_v35 = vmul.f32 1.442695, %v502_v22  ;;  %v520_v36 = vmul.f32 1.442695, %v503_v25  ;;  %v522_v46 = vmul.f32 1.442695, %v504_v27  ;;  %v480_v3 = vsub.f32 %v1136_v20, %v1389_v4 }
 0x1a3   :  { %v524_v48 = vmul.f32 1.442695, %v505_v29  ;;  %v494_v49 = vand.u32 2147483647, %v478_v53  ;;  %v508_v50 = vmul.f32 -1.0, %v492_v31  ;;  %v481_v10 = vsub.f32 %v1142_v23, %v1389_v4 }
 0x1a4   :  { %778 = vpow2.f32 %v518_v35  ;;  %v526_v61 = vmul.f32 1.442695, %v506_v32  ;;  %v495_v51 = vand.u32 2147483647, %v479_v63  ;;  %v509_v55 = vmul.f32 -1.0, %v493_v56 }
 0x1a5   :  { %780 = vpow2.f32 %v520_v36  ;;  %v528_v57 = vmul.f32 1.442695, %v507_v38  ;;  %v482_v13 = vsub.f32 %v1150_v30, %v1389_v4  ;;  %v496_v59 = vand.u32 2147483647, %v480_v3 }
 0x1a6   :  { %782 = vpow2.f32 %v522_v46  ;;  %v510_v60 = vmul.f32 -1.0, %v494_v49  ;;  %v530_v20 = vmul.f32 1.442695, %v508_v50  ;;  %v483_v62 = vsub.f32 %v1156_v33, %v1389_v4 }
 0x1a7   :  { %784 = vpow2.f32 %v524_v48  ;;  %v497_v0 = vand.u32 2147483647, %v481_v10  ;;  %v511_v6 = vmul.f32 -1.0, %v495_v51  ;;  %v532_v54 = vmul.f32 1.442695, %v509_v55 }
 0x1a8   :  { %786 = vpow2.f32 %v526_v61  ;;  %v484_v23 = vsub.f32 %v1164_v43, %v1389_v4  ;;  %v498_v7 = vand.u32 2147483647, %v482_v13  ;;  %v512_v8 = vmul.f32 -1.0, %v496_v59 }
 0x1a9   :  { %788 = vpow2.f32 %v528_v57  ;;  %v534_v11 = vmul.f32 1.442695, %v510_v60  ;;  %v485_v30 = vsub.f32 %v1170_v47, %v1389_v4  ;;  %v499_v15 = vand.u32 2147483647, %v483_v62 }
 0x1aa   :  { %790 = vpow2.f32 %v530_v20  ;;  %v513_v18 = vmul.f32 -1.0, %v497_v0  ;;  %v536_v33 = vmul.f32 1.442695, %v511_v6  ;;  %v500_v40 = vand.u32 2147483647, %v484_v23 }
 0x1ab   :  { %792 = vpow2.f32 %v532_v54  ;;  %v514_v22 = vmul.f32 -1.0, %v498_v7  ;;  %v538_v25 = vmul.f32 1.442695, %v512_v8  ;;  %v501_v27 = vand.u32 2147483647, %v485_v30 }
 0x1ac   :  { %794 = vpow2.f32 %v534_v11  ;;  %v515_v29 = vmul.f32 -1.0, %v499_v15  ;;  %v516_v32 = vmul.f32 -1.0, %v500_v40 }
 0x1ad   :  { %796 = vpow2.f32 %v536_v33  ;;  %v542_v56 = vmul.f32 1.442695, %v514_v22  ;;  %v517_v63 = vmul.f32 -1.0, %v501_v27 }
 0x1ae   :  { %v779_v12 = vpop.eup %778  ;;  %798 = vpow2.f32 %v538_v25  ;;  %v544_v38 = vmul.f32 1.442695, %v515_v29  ;;  %v546_v3 = vmul.f32 1.442695, %v516_v32 }
 0x1af   :  { %v781_v16 = vpop.eup %780  ;;  %v1424_v21 = vmul.f32 %v779_v12, %v1188_v1  ;;  %v540_v1 = vmul.f32 1.442695, %v513_v18  ;;  %v548_v61 = vmul.f32 1.442695, %v517_v63 }
 0x1b0   :  { %v783_v37 = vpop.eup %782  ;;  %v1427_v41 = vmul.f32 %v781_v16, %v1179_v34 }
 0x1b1   :  { %v785_v43 = vpop.eup %784  ;;  %v1430_v45 = vmul.f32 %v783_v37, %v1209_v17  ;;  %800 = vpow2.f32 %v540_v1  ;;  %v587_v12 = vrot.slane %v1424_v21, 4 }
 0x1b2   :  { %v566_v47 = vadd.f32 %v1427_v41, %v1424_v21  ;;  %v787_v4 = vpop.eup %786  ;;  %v1435_v53 = vmul.f32 %v785_v43, %v1199_v14  ;;  %802 = vpow2.f32 %v542_v56  ;;  %v593_v30 = vrot.slane %v1427_v41, 4 }
 0x1b3   :  { %v789_v31 = vpop.eup %788  ;;  %v1439_v17 = vmul.f32 %v787_v4, %v1231_v28  ;;  %804 = vpow2.f32 %v544_v38  ;;  %v588_v18 = vadd.f32 %v587_v12, %v1424_v21 }
 0x1b4   :  { %v567_v34 = vadd.f32 %v566_v47, %v1430_v45  ;;  %v791_v36 = vpop.eup %790  ;;  %v1443_v46 = vmul.f32 %v789_v31, %v1221_v24  ;;  %806 = vpow2.f32 %v546_v3  ;;  %v594_v33 = vadd.f32 %v593_v30, %v1427_v41 }
 0x1b5   :  { %v793_v48 = vpop.eup %792  ;;  %v556_v49 = vmul.f32 %v791_v36, %v1253_v44  ;;  %808 = vpow2.f32 %v548_v61  ;;  %v589_v40 = vrot.slane %v588_v18, 2 }
 0x1b6   :  { %v568_v35 = vadd.f32 %v567_v34, %v1435_v53  ;;  %v795_v28 = vpop.eup %794  ;;  %v557_v10 = vmul.f32 %v793_v48, %v1247_v2  ;;  %v595_v25 = vrot.slane %v594_v33, 2  ;;  %v617_v47 = vrot.slane %v1443_v46, 4 }
 0x1b7   :  { %v797_v55 = vpop.eup %796  ;;  %v558_v24 = vmul.f32 %v795_v28, %v1273_v58 }
 0x1b8   :  { %v569_v14 = vadd.f32 %v568_v35, %v1439_v17  ;;  %v799_v13 = vpop.eup %798  ;;  %v559_v59 = vmul.f32 %v797_v55, %v1267_v52  ;;  %v629_v27 = vrot.slane %v557_v10, 4  ;;  %v618_v38 = vadd.f32 %v617_v47, %v1443_v46 }
 0x1b9   :  { %v560_v44 = vmul.f32 %v799_v13, %v1293_v9  ;;  %v635_v21 = vrot.slane %v558_v24, 4 }
 0x1ba   :  { %v570_v50 = vadd.f32 %v569_v14, %v1443_v46  ;;  %v641_v29 = vrot.slane %v559_v59, 4  ;;  %v630_v3 = vadd.f32 %v629_v27, %v557_v10 }
 0x1bb   :  { %v801_v20 = vpop.eup %800  ;;  %v647_v41 = vrot.slane %v560_v44, 4 }
 0x1bc   :  { %v571_v51 = vadd.f32 %v570_v50, %v556_v49  ;;  %v803_v0 = vpop.eup %802  ;;  %v561_v6 = vmul.f32 %v801_v20, %v1287_v5  ;;  %v636_v50 = vadd.f32 %v635_v21, %v558_v24  ;;  %v642_v28 = vadd.f32 %v641_v29, %v559_v59 }
 0x1bd   :  { %v805_v2 = vpop.eup %804  ;;  %v562_v23 = vmul.f32 %v803_v0, %v1313_v26  ;;  %v599_v26 = vrot.slane %v1430_v45, 4 }
 0x1be   :  { %v572_v57 = vadd.f32 %v571_v51, %v557_v10  ;;  %v807_v8 = vpop.eup %806  ;;  %v563_v58 = vmul.f32 %v805_v2, %v1307_v19  ;;  %v605_v19 = vrot.slane %v1435_v53, 4  ;;  %v653_v34 = vrot.slane %v561_v6, 4 }
 0x1bf   :  { %v809_v52 = vpop.eup %808  ;;  %v564_v9 = vmul.f32 %v807_v8, %v1332_v42  ;;  %v600_v22 = vadd.f32 %v599_v26, %v1430_v45  ;;  %v611_v42 = vrot.slane %v1439_v17, 4  ;;  %v659_v31 = vrot.slane %v562_v23, 4 }
 0x1c0   :  { %v573_v60 = vadd.f32 %v572_v57, %v558_v24  ;;  %v565_v16 = vmul.f32 %v809_v52, %v1327_v39  ;;  %v623_v39 = vrot.slane %v556_v49, 4  ;;  %v606_v1 = vadd.f32 %v605_v19, %v1435_v53 }
 0x1c1   :  { %v665_v56 = vrot.slane %v563_v58, 4  ;;  %v671_v35 = vrot.slane %v564_v9, 4  ;;  %v590_v45 = vadd.f32 %v589_v40, %v588_v18  ;;  %v612_v63 = vadd.f32 %v611_v42, %v1439_v17 }
 0x1c2   :  { %v574_v62 = vadd.f32 %v573_v60, %v559_v59  ;;  %v677_v36 = vrot.slane %v565_v16, 4  ;;  %v624_v14 = vadd.f32 %v623_v39, %v556_v49  ;;  %v601_v61 = vrot.slane %v600_v22, 2 }
 0x1c3   :  { %v648_v51 = vadd.f32 %v647_v41, %v560_v44  ;;  %v654_v53 = vadd.f32 %v653_v34, %v561_v6  ;;  %v660_v55 = vadd.f32 %v659_v31, %v562_v23  ;;  %v666_v13 = vadd.f32 %v665_v56, %v563_v58 }
 0x1c4   :  { %v575_v54 = vadd.f32 %v574_v62, %v560_v44  ;;  %v672_v60 = vadd.f32 %v671_v35, %v564_v9  ;;  %v678_v20 = vadd.f32 %v677_v36, %v565_v16  ;;  %v607_v62 = vrot.slane %v606_v1, 2 }
 0x1c5   :  { %v613_v0 = vrot.slane %v612_v63, 2  ;;  %v625_v2 = vrot.slane %v624_v14, 2  ;;  %v637_v46 = vrot.slane %v636_v50, 2  ;;  %v643_v49 = vrot.slane %v642_v28, 2 }
 0x1c6   :  { %v576_v7 = vadd.f32 %v575_v54, %v561_v6  ;;  %v619_v54 = vrot.slane %v618_v38, 2  ;;  %v596_v8 = vadd.f32 %v595_v25, %v594_v33  ;;  %v649_v10 = vrot.slane %v648_v51, 2 }
 0x1c7   :  { %v655_v24 = vrot.slane %v654_v53, 2  ;;  %v661_v59 = vrot.slane %v660_v55, 2  ;;  %v673_v44 = vrot.slane %v672_v60, 2  ;;  %v679_v6 = vrot.slane %v678_v20, 2 }
 0x1c8   :  { %v577_v11 = vadd.f32 %v576_v7, %v562_v23  ;;  %v631_v7 = vrot.slane %v630_v3, 2  ;;  %v602_v23 = vadd.f32 %v601_v61, %v600_v22  ;;  %v614_v12 = vadd.f32 %v613_v0, %v612_v63 }
 0x1c9   :  { %v620_v52 = vadd.f32 %v619_v54, %v618_v38  ;;  %v626_v30 = vadd.f32 %v625_v2, %v624_v14  ;;  %v597_v18 = vrot.slane %v596_v8, 1  ;;  %v650_v26 = vadd.f32 %v649_v10, %v648_v51 }
 0x1ca   :  { %v578_v15 = vadd.f32 %v577_v11, %v563_v58  ;;  %v667_v11 = vrot.slane %v666_v13, 2  ;;  %v608_v58 = vadd.f32 %v607_v62, %v606_v1  ;;  %v662_v33 = vadd.f32 %v661_v59, %v660_v55 }
 0x1cb   :  { %v680_v40 = vadd.f32 %v679_v6, %v678_v20  ;;  %v603_v25 = vrot.slane %v602_v23, 1  ;;  %v615_v47 = vrot.slane %v614_v12, 1  ;;  %v621_v39 = vrot.slane %v620_v52, 1 }
 0x1cc   :  { %v579_v5 = vadd.f32 %v578_v15, %v564_v9  ;;  %v632_v9 = vadd.f32 %v631_v7, %v630_v3  ;;  %v638_v15 = vadd.f32 %v637_v46, %v636_v50  ;;  %v668_v19 = vadd.f32 %v667_v11, %v666_v13 }
 0x1cd   :  { %v609_v42 = vrot.slane %v608_v58, 1  ;;  %v627_v22 = vrot.slane %v626_v30, 1  ;;  %v598_v1 = vadd.f32 %v597_v18, %v596_v8  ;;  %v651_v41 = vrot.slane %v650_v26, 1 }
 0x1ce   :  { %v580_v37 = vadd.f32 %v579_v5, %v565_v16  ;;  %v644_v16 = vadd.f32 %v643_v49, %v642_v28  ;;  %v591_v5 = vrot.slane %v590_v45, 1  ;;  %v639_v27 = vrot.slane %v638_v15, 1 }
 0x1cf   :  { %v663_v31 = vrot.slane %v662_v33, 1  ;;  %v681_v35 = vrot.slane %v680_v40, 1  ;;  %v604_v36 = vadd.f32 %v603_v25, %v602_v23  ;;  %v610_v63 = vadd.f32 %v609_v42, %v608_v58 }
 0x1d0   :  { %v581_v43 = vrot.slane %v580_v37, 4  ;;  %v645_v21 = vrot.slane %v644_v16, 1  ;;  %v592_v29 = vadd.f32 %v591_v5, %v590_v45  ;;  %v616_v38 = vadd.f32 %v615_v47, %v614_v12 }
 0x1d1   :  { %v622_v14 = vadd.f32 %v621_v39, %v620_v52  ;;  %v628_v3 = vadd.f32 %v627_v22, %v626_v30  ;;  %v640_v28 = vadd.f32 %v639_v27, %v638_v15  ;;  %v652_v45 = vadd.f32 %v651_v41, %v650_v26 }
 0x1d2   :  { %v582_v4 = vadd.f32 %v581_v43, %v580_v37  ;;  %v656_v37 = vadd.f32 %v655_v24, %v654_v53  ;;  %v674_v43 = vadd.f32 %v673_v44, %v672_v60  ;;  %v646_v61 = vadd.f32 %v645_v21, %v644_v16 }
 0x1d3   :  { %v682_v20 = vadd.f32 %v681_v35, %v680_v40 }
 0x1d4   :  { %v583_v32 = vrot.slane %v582_v4, 2  ;;  %v657_v34 = vrot.slane %v656_v37, 1  ;;  %v675_v56 = vrot.slane %v674_v43, 1 }
 0x1d6   :  { %v584_v48 = vadd.f32 %v583_v32, %v582_v4  ;;  %v633_v4 = vrot.slane %v632_v9, 1  ;;  %v669_v32 = vrot.slane %v668_v19, 1  ;;  %v658_v51 = vadd.f32 %v657_v34, %v656_v37 }
 0x1d7   :  { %v676_v60 = vadd.f32 %v675_v56, %v674_v43 }
 0x1d8   :  { %v585_v57 = vrot.slane %v584_v48, 1  ;;  %v634_v50 = vadd.f32 %v633_v4, %v632_v9  ;;  %v670_v13 = vadd.f32 %v669_v32, %v668_v19 }
 0x1da   :  { %v586_v17 = vadd.f32 %v585_v57, %v584_v48  ;;  %v664_v57 = vadd.f32 %v663_v31, %v662_v33 }
 0x1dc   :  { %810 = vrcp.f32 %v586_v17 }
 0x1e6   :  { %v811_v48 = vpop.eup %810 }
 0x1e7   :  { %v685_v53 = vmul.f32 %v811_v48, %v598_v1  ;;  %v686_v55 = vmul.f32 %v811_v48, %v604_v36  ;;  %v684_v62 = vmul.f32 %v811_v48, %v592_v29  ;;  %v687_v0 = vmul.f32 %v811_v48, %v610_v63 }
 0x1e8   :  { %v693_v54 = vmul.f32 %v811_v48, %v646_v61  ;;  %v694_v2 = vmul.f32 %v811_v48, %v652_v45  ;;  %v688_v17 = vmul.f32 %v811_v48, %v616_v38  ;;  %v689_v7 = vmul.f32 %v811_v48, %v622_v14 }
 0x1e9   :  { %v690_v46 = vmul.f32 %v811_v48, %v628_v3  ;;  %v695_v49 = vmul.f32 %v811_v48, %v658_v51  ;;  %v691_v8 = vmul.f32 %v811_v48, %v634_v50  ;;  %v696_v10 = vmul.f32 %v811_v48, %v664_v57 }
 0x1ea   :  { %v716_v24 = vrot.slane %v685_v53, 7  ;;  %v719_v59 = vrot.slane %v686_v55, 6  ;;  %v692_v11 = vmul.f32 %v811_v48, %v640_v28  ;;  %v697_v44 = vmul.f32 %v811_v48, %v670_v13 }
 0x1eb   :  { %v698_v6 = vmul.f32 %v811_v48, %v676_v60  ;;  %v737_v23 = vrot.slane %v693_v54, 7  ;;  %v699_v58 = vmul.f32 %v811_v48, %v682_v20  ;;  %v722_v52 = vrot.slane %v687_v0, 5 }
 0x1ec   :  { %v718_v12 = vsel %vm717_vm1, %v716_v24, %v684_v62  ;;  %v739_v30 = vrot.slane %v694_v2, 6  ;;  %v725_v15 = vrot.slane %v688_v17, 4  ;;  %v741_v5 = vrot.slane %v695_v49, 5 }
 0x1ed   :  { %v721_v9 = vsel %vm720_vm2, %v719_v59, %v718_v12  ;;  %v738_v16 = vsel %vm717_vm1, %v737_v23, %v692_v11  ;;  %v728_v26 = vrot.slane %v689_v7, 3  ;;  %v743_v33 = vrot.slane %v696_v10, 4 }
 0x1ee   :  { %v724_v18 = vsel %vm723_vm3, %v722_v52, %v721_v9  ;;  %v740_v37 = vsel %vm720_vm2, %v739_v30, %v738_v16  ;;  %v731_v43 = vrot.slane %v690_v46, 2  ;;  %v745_v25 = vrot.slane %v697_v44, 3 }
 0x1ef   :  { %v727_v19 = vsel %vm726_vm4, %v725_v15, %v724_v18  ;;  %v742_v40 = vsel %vm723_vm3, %v741_v5, %v740_v37  ;;  %v734_v47 = vrot.slane %v691_v8, 1  ;;  %v747_v22 = vrot.slane %v698_v6, 2 }
 0x1f0   :  { %v730_v42 = vsel %vm729_vm5, %v728_v26, %v727_v19  ;;  %v744_v39 = vsel %vm726_vm4, %v743_v33, %v742_v40  ;;  %v749_v21 = vrot.slane %v699_v58, 1 }
 0x1f1   :  { %v733_v4 = vsel %vm732_vm6, %v731_v43, %v730_v42  ;;  %v746_v27 = vsel %vm729_vm5, %v745_v25, %v744_v39 }
 0x1f2   :  { %v736_v29 = vsel %vm735_vm7, %v734_v47, %v733_v4  ;;  %v748_v1 = vsel %vm732_vm6, %v747_v22, %v746_v27 }
 0x1f3   :  { %v750_v41 = vsel %vm735_vm7, %v749_v21, %v748_v1  ;;  %753 = vst [vmem:[#allocation7] sm:$0xff] %v736_v29 }
 0x1f4   :  { %754 = vst [vmem:[#allocation7 + $0x8] sm:$0xff] %v750_v41 }
 0x1f5   :  { %845 = shalt.err (!%p842_p12)
}
 0x1f6   :  { %s846_s11 = scalar_lea.hbm %s1506_s8, 256 }
 0x1f7   :  { %p847_p13 = scmp.ne.s32.totalorder %s1506_s8, %s846_s11  ;;  %p850_p0 = scmp.lt.u32.totalorder %s846_s11, %s1506_s8 }
 0x1f9   :  { %p852_p1 = pnand %p850_p0, %p847_p13 }
 0x1fb   :  { %855 = shalt.err (!%p852_p1)
}
 0x1fc   :  { %766 = dma.vmem_to_hbm [thread:$0]  %s761_s7, 256, %s1506_s8, [#allocation6], %s861_s15, %s861_s15, %s862_s16  }
 0x1fd   :  { %858 = dma.done.wait [#allocation6], 256  }
 0x1fe   :  { %859 = vsyncadd [#allocation6], 4294967040 }
 0x1ff   :  { %770 = vsyncpa [#allocation5], 1 }
 0x200   :  { %771 = vsyncpa [#allocation6], 1 }

</bundles_post_ra>
